<compile_context>
chip_gen: v6e
topology: v6e:2x2x1
jax: 0.10.0
libtpu: 0.0.40
codegen_flags: <defaults>
</compile_context>

<pallas_src>
import functools

import jax
import jax.numpy as jnp
from jax import lax
from jax.experimental import pallas as pl
from jax.experimental.pallas import tpu as pltpu

LANE = 128        # vreg lane width
SUB = 8           # vreg sublanes
TILE_R = 4096     # rows per grid step: 4096*128*4B = 2 MiB f32 block
NUM_CORES = 2     # leading "parallel" grid axis for pass 1 (megacore on v7x)


def _fused_caps():
    """Returns (max fused footprint bytes, vmem_limit_bytes), per-generation safe."""
    try:
        vmem = int(pltpu.get_tpu_info().vmem_capacity_bytes)
    except Exception:
        vmem = 64 * 1024 * 1024          # assume the smallest (v7x per-core) VMEM
    if vmem >= 128 * 1024 * 1024:        # v5e / v6e (128 MiB physical)
        return 48 * 1024 * 1024, 80 * 1024 * 1024
    return 32 * 1024 * 1024, 48 * 1024 * 1024   # v7x (64 MiB) or unknown


# --------------------------- fused small-tensor kernel ----------------------
def _fused_kernel(x_ref, o_ref, *, range_val, epsilon):
    x = x_ref[...].astype(jnp.float32)
    mn = jnp.min(x)
    mx = jnp.max(x)
    scale = range_val / ((mx - mn) + epsilon)
    o_ref[...] = ((x - mn) * scale).astype(o_ref.dtype)


# ----------------------- pass 1: global min / max (tiled) -------------------
def _minmax_kernel(x_ref, mn_ref, mx_ref, accmin_ref, accmax_ref, *,
                   blocks_per_core, total_rows, first_masked_block):
    c = pl.program_id(0)          # core axis ("parallel")
    i = pl.program_id(1)          # row-block axis ("arbitrary")

    @pl.when(i == 0)
    def _init():
        accmin_ref[...] = jnp.full((SUB, LANE), jnp.inf, jnp.float32)
        accmax_ref[...] = jnp.full((SUB, LANE), -jnp.inf, jnp.float32)

    x = x_ref[...].astype(jnp.float32)

    def _accumulate(x_for_min, x_for_max):
        # Tree-reduce the 2 MiB tile to one (8,128) vreg on the VPU: the
        # leading-axis reduction combines whole vregs elementwise (no XLU),
        # and the accumulators stay a single vreg each (no big VMEM stores).
        pmin = jnp.min(x_for_min.reshape(TILE_R // SUB, SUB, LANE), axis=0)
        pmax = jnp.max(x_for_max.reshape(TILE_R // SUB, SUB, LANE), axis=0)
        accmin_ref[...] = jnp.minimum(accmin_ref[...], pmin)
        accmax_ref[...] = jnp.maximum(accmax_ref[...], pmax)

    g = c * blocks_per_core + i   # global row-block index

    if first_masked_block is None:
        _accumulate(x, x)
    else:
        # Masking only on the ragged last block / clamped phantom blocks.
        @pl.when(g < first_masked_block)
        def _full():
            _accumulate(x, x)

        @pl.when(g >= first_masked_block)
        def _ragged():
            row = g * TILE_R + lax.broadcasted_iota(jnp.int32, (TILE_R, LANE), 0)
            valid = row < total_rows
            _accumulate(jnp.where(valid, x, jnp.inf),
                        jnp.where(valid, x, -jnp.inf))

    @pl.when(i == blocks_per_core - 1)
    def _epilogue():
        mn_ref[0, 0] = jnp.min(accmin_ref[...])
        mx_ref[0, 0] = jnp.max(accmax_ref[...])


# ------------------- pass 2: out = x * scale + offset (tiled) ---------------
def _scale_kernel(scale_ref, offset_ref, x_ref, o_ref):
    s = scale_ref[0, 0]
    b = offset_ref[0, 0]
    o_ref[...] = (x_ref[...].astype(jnp.float32) * s + b).astype(o_ref.dtype)


# ----------------------------------- wrapper --------------------------------
@functools.partial(jax.jit, static_argnames=("range_val", "epsilon", "force_tiled"))
def _scale_dynamic_range_impl(x, *, range_val, epsilon, force_tiled=False):
    orig_shape = x.shape
    out_dtype = x.dtype if jnp.issubdtype(x.dtype, jnp.floating) else jnp.float32
    n = x.size

    fused_cap, fused_vmem_limit = _fused_caps()
    footprint = n * (x.dtype.itemsize + jnp.dtype(out_dtype).itemsize + 8)

    # ---- fused fast path: whole array resident in VMEM (2N HBM traffic) ----
    if footprint <= fused_cap and not force_tiled:
        xf = x.reshape(-1)
        pad = (-n) % LANE
        if pad:
            xf = jnp.pad(xf, (0, pad), mode="edge")   # edge value is min/max-neutral
        x2 = xf.reshape(-1, LANE)
        out2 = pl.pallas_call(
            functools.partial(_fused_kernel, range_val=range_val, epsilon=epsilon),
            out_shape=jax.ShapeDtypeStruct(x2.shape, out_dtype),
            compiler_params=pltpu.CompilerParams(vmem_limit_bytes=fused_vmem_limit),
        )(x2)
        out = out2.reshape(-1)
        if pad:
            out = out[:n]
        return out.reshape(orig_shape)

    # ---- tiled two-pass path (3N HBM traffic) -------------------------------
    xf = x.reshape(-1)
    pad = (-n) % LANE
    if pad:
        # TODO(synk): mask the <128-element lane tail in-kernel instead of
        # paying a full-array pad + output slice for lane-ragged large sizes.
        xf = jnp.pad(xf, (0, pad), mode="edge")
    rows = xf.shape[0] // LANE
    x2 = xf.reshape(rows, LANE)

    nblocks = pl.cdiv(rows, TILE_R)
    bpc = pl.cdiv(nblocks, NUM_CORES)      # row-blocks per core
    first_masked = rows // TILE_R          # first block needing a row mask
    mask_needed = (NUM_CORES * bpc) > first_masked

    def _p1_in_index_map(c, i):
        # Clamp so the (possible) phantom block on the second core re-reads a
        # valid block; its rows are masked out inside the kernel.
        return (jnp.minimum(c * bpc + i, nblocks - 1), 0)

    # Pass 1: per-core partial min / max.
    mn_parts, mx_parts = pl.pallas_call(
        functools.partial(
            _minmax_kernel,
            blocks_per_core=bpc,
            total_rows=rows,
            first_masked_block=(first_masked if mask_needed else None)),
        out_shape=(jax.ShapeDtypeStruct((NUM_CORES, 1), jnp.float32),
                   jax.ShapeDtypeStruct((NUM_CORES, 1), jnp.float32)),
        grid_spec=pltpu.PrefetchScalarGridSpec(
            num_scalar_prefetch=0,
            grid=(NUM_CORES, bpc),
            in_specs=[pl.BlockSpec((TILE_R, LANE), _p1_in_index_map)],
            out_specs=(
                pl.BlockSpec((1, 1), lambda c, i: (c, 0)),
                pl.BlockSpec((1, 1), lambda c, i: (c, 0)),
            ),
            scratch_shapes=[pltpu.VMEM((SUB, LANE), jnp.float32),
                            pltpu.VMEM((SUB, LANE), jnp.float32)],
        ),
        compiler_params=pltpu.CompilerParams(
            dimension_semantics=("parallel", "arbitrary")),
    )(x2)

    # Combine per-core partials; tiny scalar ops fused by XLA under jit.
    mn = jnp.min(mn_parts)
    mx = jnp.max(mx_parts)
    scale = (range_val / ((mx - mn) + epsilon)).astype(jnp.float32)
    offset = (-mn * scale).astype(jnp.float32)
    scale2 = scale.reshape(1, 1)
    offset2 = offset.reshape(1, 1)

    # Pass 2: out = x * scale + offset, scalars streamed from SMEM.
    out2 = pl.pallas_call(
        _scale_kernel,
        out_shape=jax.ShapeDtypeStruct((rows, LANE), out_dtype),
        grid_spec=pltpu.PrefetchScalarGridSpec(
            num_scalar_prefetch=0,
            grid=(nblocks,),
            in_specs=[
                pl.BlockSpec((1, 1), lambda i: (0, 0), memory_space=pltpu.SMEM),
                pl.BlockSpec((1, 1), lambda i: (0, 0), memory_space=pltpu.SMEM),
                pl.BlockSpec((TILE_R, LANE), lambda i: (i, 0)),
            ],
            out_specs=pl.BlockSpec((TILE_R, LANE), lambda i: (i, 0)),
        ),
        compiler_params=pltpu.CompilerParams(
            dimension_semantics=("parallel",)),
    )(scale2, offset2, x2)

    out = out2.reshape(-1)
    if pad:
        out = out[:n]
    return out.reshape(orig_shape)


def scale_dynamic_range(x, scaler_bounds=(0.0, 1.0), epsilon=1e-9, *, _force_tiled=False):
    """Global min-max scaling of the whole tensor (Pallas TPU implementation).

    Note: integer inputs are promoted to float32 before min/max, so int values
    above 2**24 can round (unlike PyTorch's integer min/max before promotion).
    """
    range_val = float(scaler_bounds[1] - scaler_bounds[0])
    x = jnp.asarray(x)
    if x.size == 0:
        out_dtype = x.dtype if jnp.issubdtype(x.dtype, jnp.floating) else jnp.float32
        return jnp.zeros(x.shape, dtype=out_dtype)
    return _scale_dynamic_range_impl(
        x, range_val=range_val, epsilon=float(epsilon), force_tiled=_force_tiled)


# --------------------------- reference (pure JAX) ----------------------------
def _reference(x, scaler_bounds=(0.0, 1.0), epsilon=1e-9):
    rng = float(scaler_bounds[1] - scaler_bounds[0])
    xf = x.astype(jnp.float32)
    t = xf - jnp.min(xf)
    return t * (rng / (jnp.max(t) + epsilon))


if __name__ == "__main__":
    key = jax.random.PRNGKey(0)
    k1, k2, k3, k4, k5, k6 = jax.random.split(key, 6)

    ok = True

    def check(out, x, out_dtype, atol, rtol):
        ref = _reference(x).astype(out_dtype)
        good = out.shape == x.shape and out.dtype == jnp.dtype(out_dtype)
        good &= bool(jnp.allclose(out.astype(jnp.float32), ref.astype(jnp.float32),
                                  atol=atol, rtol=rtol))
        return good

    # 1) Small NCHW tensor (module's typical use) -> fused single-call path.
    x1 = jax.random.normal(k1, (2, 4, 16, 16), dtype=jnp.float32) * 3.0 + 1.5
    o1 = jax.block_until_ready(scale_dynamic_range(x1))
    ok &= check(o1, x1, jnp.float32, 1e-6, 1e-6)

    # 2) Lane-ragged small tensor (n % 128 != 0) -> fused path with small pad.
    x2 = jax.random.normal(k2, (2, 3, 17, 19), dtype=jnp.float32) * 2.0 - 0.7
    o2 = jax.block_until_ready(scale_dynamic_range(x2))
    ok &= check(o2, x2, jnp.float32, 1e-6, 1e-6)

    # 3) Integer input -> float32 output (promotion semantics).
    x3 = jax.random.randint(k3, (4, 50), 0, 255, dtype=jnp.int32)
    o3 = jax.block_until_ready(scale_dynamic_range(x3))
    ok &= check(o3, x3, jnp.float32, 1e-6, 1e-6)

    # 4) Larger f32 tensor -> natural two-pass tiled path (multi-block per core).
    x4 = jax.random.normal(k4, (16, 8, 128, 256), dtype=jnp.float32) * 2.0 - 0.3
    o4 = jax.block_until_ready(scale_dynamic_range(x4))
    ok &= check(o4, x4, jnp.float32, 1e-5, 1e-5)

    # 5) bf16 tensor, ragged last row-block -> tiled path with masked block.
    x5 = (jax.random.normal(k5, (5, 7, 123, 128), dtype=jnp.float32) * 4.0
          + 0.7).astype(jnp.bfloat16)
    o5 = jax.block_until_ready(scale_dynamic_range(x5, _force_tiled=True))
    ok &= check(o5, x5, jnp.bfloat16, 1e-2, 1e-2)

    # 6) Odd number of row-blocks -> tiled path with clamped phantom block.
    x6 = jax.random.normal(k6, (3, 4, 128, 1024), dtype=jnp.float32) * 5.0
    o6 = jax.block_until_ready(scale_dynamic_range(x6, _force_tiled=True))
    ok &= check(o6, x6, jnp.float32, 1e-5, 1e-5)

    assert ok, "mismatch vs reference"
    print("KERNEL_OK")
</pallas_src>

<mosaic_0001>
module attributes {stable_mosaic.version = 11 : i64} {
  func.func @_fused_kernel(%arg0: memref<16x128xf32, #tpu.memory_space<vmem>>, %arg1: memref<16x128xf32, #tpu.memory_space<vmem>>) attributes {dimension_semantics = [], scalar_prefetch = 0 : i64, scratch_operands = 0 : i64, tpu.core_type = #tpu.core_type<tc>} {
    %c0 = arith.constant 0 : index
    %c0_0 = arith.constant 0 : index
    %0 = vector.load %arg0[%c0, %c0_0] : memref<16x128xf32, #tpu.memory_space<vmem>>, vector<16x128xf32>
    %1 = vector.shape_cast %0 : vector<16x128xf32> to vector<1x16x128xf32>
    %cst = arith.constant dense<0x7F800000> : vector<1xf32>
    %2 = vector.multi_reduction <minimumf>, %1, %cst [1, 2] : vector<1x16x128xf32> to vector<1xf32>
    %3 = vector.shape_cast %2 : vector<1xf32> to vector<1x1x1xf32>
    %4 = vector.extract %3[0, 0, 0] : f32 from vector<1x1x1xf32>
    %5 = vector.shape_cast %0 : vector<16x128xf32> to vector<1x16x128xf32>
    %cst_1 = arith.constant dense<0xFF800000> : vector<1xf32>
    %6 = vector.multi_reduction <maximumf>, %5, %cst_1 [1, 2] : vector<1x16x128xf32> to vector<1xf32>
    %7 = vector.shape_cast %6 : vector<1xf32> to vector<1x1x1xf32>
    %8 = vector.extract %7[0, 0, 0] : f32 from vector<1x1x1xf32>
    %9 = arith.subf %8, %4 : f32
    %cst_2 = arith.constant 9.99999971E-10 : f32
    %10 = arith.addf %9, %cst_2 : f32
    %cst_3 = arith.constant 1.000000e+00 : f32
    %11 = arith.divf %cst_3, %10 : f32
    %12 = vector.broadcast %4 : f32 to vector<16x128xf32>
    %13 = arith.subf %0, %12 : vector<16x128xf32>
    %14 = vector.broadcast %11 : f32 to vector<16x128xf32>
    %15 = arith.mulf %13, %14 : vector<16x128xf32>
    %c0_4 = arith.constant 0 : index
    %c0_5 = arith.constant 0 : index
    %16 = vector.load %arg1[%c0_4, %c0_5] : memref<16x128xf32, #tpu.memory_space<vmem>>, vector<16x128xf32>
    tpu.vector_store %arg1[%c0_4, %c0_5], %15 {strides = array<i32>} : memref<16x128xf32, #tpu.memory_space<vmem>>, vector<16x128xf32>,
    return
  }
}

</mosaic_0001>

<bundles_post_ra>
// kernel: _scale_dynamic_range_impl.1
= control target key start
LH: loop header
LB: loop body
LE: loop exit
PB: predicated region body
PF: predicated region fallthrough
CT: control target
= control target key end

     0   :  { %s77_s0 = inlined_call_operand.vmem [shape: f32[16,128], index: 0, kind: input, shape index: {}]   ;;  %s78_s1 = inlined_call_operand.vmem [shape: f32[16,128], index: 1, kind: output, shape index: {}]  }
   0x1   :  { %v8_v0 = vld [vmem:[%s77_s0] sm:$0xff]  ;;  %v9_v1 = vld [vmem:[%s77_s0 + $0x8] sm:$0xff] }
   0x2   :  { %v10_v2 = vmin.f32 %v8_v0, %v9_v1  ;;  %v20_v3 = vmax.f32 %v8_v0, %v9_v1 }
   0x4   :  { %11 = vmin.xlane.f32.xlu0 %v10_v2 }
   0x8   :  { %21 = vmax.xlane.f32.xlu0 %v20_v3 }
  0x8d   :  { %v12_v4 = vpop.xlane.xlu0 %11 }
  0x8e   :  { %v13_v5 = vrot.slane %v12_v4, 4 }
  0x90   :  { %v14_v6 = vmin.f32 %v12_v4, %v13_v5 }
  0x91   :  { %v22_v7 = vpop.xlane.xlu0 %21 }
  0x92   :  { %v15_v8 = vrot.slane %v14_v6, 2  ;;  %v23_v9 = vrot.slane %v22_v7, 4 }
  0x94   :  { %v24_v10 = vmax.f32 %v22_v7, %v23_v9  ;;  %v16_v11 = vmin.f32 %v14_v6, %v15_v8 }
  0x96   :  { %v25_v12 = vrot.slane %v24_v10, 2  ;;  %v17_v13 = vrot.slane %v16_v11, 1 }
  0x98   :  { %v26_v14 = vmax.f32 %v24_v10, %v25_v12  ;;  %v18_v15 = vmin.f32 %v16_v11, %v17_v13 }
  0x9a   :  { %47 = vpush %v18_v15  ;;  %v27_v16 = vrot.slane %v26_v14, 1 }
  0x9c   :  { %v28_v17 = vmax.f32 %v26_v14, %v27_v16 }
  0x9e   :  { %49 = vpush %v28_v17 }
  0xcb   :  { %s48_s0 = spop %47 }
  0xcc   :  { %v35_v20 = vstv %s48_s0 }
  0xcd   :  { %v36_v21 = vsub.f32 %v8_v0, %v35_v20  ;;  %v37_v22 = vsub.f32 %v9_v1, %v35_v20 }
  0xcf   :  { %s50_s10 = spop %49 }
  0xd0   :  { %s30_s11 = ssub.f32 %s50_s10, %s48_s0 }
  0xd2   :  { %s31_s12 = sadd.f32 1e-09, %s30_s11 }
  0xd4   :  { %v32_v18 = vstv %s31_s12 }
  0xd5   :  { %53 = vrcp.f32 %v32_v18 }
  0xe2   :  { %v54_v19 = vpop.eup %53 }
  0xe3   :  { %51 = vpush %v54_v19 }
 0x114   :  { %s52_s13 = spop %51 }
 0x115   :  { %v38_v23 = vstv %s52_s13 }
 0x116   :  { %v39_v24 = vmul.f32 %v38_v23, %v36_v21  ;;  %v40_v25 = vmul.f32 %v38_v23, %v37_v22 }
 0x118   :  { %41 = vst [vmem:[%s78_s1] sm:$0xff] %v39_v24  ;;  %42 = vst [vmem:[%s78_s1 + $0x8] sm:$0xff] %v40_v25 }

</bundles_post_ra>
